<compile_context>
chip_gen: v7x
topology: tpu7x:2x2x1
jax: 0.10.0
libtpu: 0.0.40
codegen_flags: <defaults>
</compile_context>

<pallas_src>
import jax
import jax.numpy as jnp
from jax.experimental import pallas as pl
from jax.experimental.pallas import tpu as pltpu


# ----------------------------------------------------------------------------
# Kernels
# ----------------------------------------------------------------------------
def _maxpool_mapping_kernel(h_ref, w_ref, b_ref, o_ref, pooled_ref):
    # h_ref: (TB, TS, H) f32   w_ref: (H, D) f32   b_ref: (1, D) f32
    # o_ref: (TB, D) f32       pooled_ref: (TB, H) f32 scratch (running max)
    j = pl.program_id(1)

    @pl.when(j == 0)
    def _():
        pooled_ref[...] = jnp.full_like(pooled_ref, -jnp.inf)

    pooled_ref[...] = jnp.maximum(pooled_ref[...],
                                  jnp.max(h_ref[...], axis=1))

    @pl.when(j == pl.num_programs(1) - 1)
    def _():
        o_ref[...] = (
            jnp.dot(pooled_ref[...].astype(jnp.bfloat16),
                    w_ref[...].astype(jnp.bfloat16),
                    preferred_element_type=jnp.float32)
            + b_ref[...]
        )


def _cls_mapping_kernel(p_ref, w_ref, b_ref, o_ref):
    # p_ref: (TB, H) f32 pooler_output tile
    o_ref[...] = (
        jnp.dot(p_ref[...].astype(jnp.bfloat16),
                w_ref[...].astype(jnp.bfloat16),
                preferred_element_type=jnp.float32)
        + b_ref[...]
    )


# ----------------------------------------------------------------------------
# Wrappers (single fused launch per mode)
# ----------------------------------------------------------------------------
def _mapping_maxpool(last_hidden_state, w, b, *, batch_tile=8, seq_tile=128):
    B, S, H = last_hidden_state.shape
    D = w.shape[1]
    tb = batch_tile if (B % batch_tile == 0) else B
    ts = seq_tile if (S % seq_tile == 0) else S
    cost = pl.CostEstimate(
        flops=2 * B * H * D + B * S * H,
        transcendentals=0,
        bytes_accessed=4 * (B * S * H + H * D + D + B * D),
    )
    return pl.pallas_call(
        _maxpool_mapping_kernel,
        out_shape=jax.ShapeDtypeStruct((B, D), jnp.float32),
        grid=(B // tb, S // ts),
        in_specs=[
            pl.BlockSpec((tb, ts, H), lambda i, j: (i, j, 0)),
            pl.BlockSpec((H, D), lambda i, j: (0, 0)),
            pl.BlockSpec((1, D), lambda i, j: (0, 0)),
        ],
        out_specs=pl.BlockSpec((tb, D), lambda i, j: (i, 0)),
        scratch_shapes=[pltpu.VMEM((tb, H), jnp.float32)],
        compiler_params=pltpu.CompilerParams(
            dimension_semantics=("parallel", "arbitrary")),
        cost_estimate=cost,
    )(last_hidden_state, w, b)


def _mapping_cls(pooler_output, w, b, *, batch_tile=8):
    B, H = pooler_output.shape
    D = w.shape[1]
    tb = batch_tile if (B % batch_tile == 0) else B
    cost = pl.CostEstimate(
        flops=2 * B * H * D,
        transcendentals=0,
        bytes_accessed=4 * (B * H + H * D + D + B * D),
    )
    return pl.pallas_call(
        _cls_mapping_kernel,
        out_shape=jax.ShapeDtypeStruct((B, D), jnp.float32),
        grid=(B // tb,),
        in_specs=[
            pl.BlockSpec((tb, H), lambda i: (i, 0)),
            pl.BlockSpec((H, D), lambda i: (0, 0)),
            pl.BlockSpec((1, D), lambda i: (0, 0)),
        ],
        out_specs=pl.BlockSpec((tb, D), lambda i: (i, 0)),
        compiler_params=pltpu.CompilerParams(
            dimension_semantics=("parallel",)),
        cost_estimate=cost,
    )(pooler_output, w, b)


# ----------------------------------------------------------------------------
# UtteranceEncoder.forward (post-encoder part)
# ----------------------------------------------------------------------------
def utterance_encoder_forward(encoder_outputs, mapping_w, mapping_b, *, mode):
    """Mirrors UtteranceEncoder.forward.

    `encoder_outputs` is either a dict with 'last_hidden_state' [B,S,H] and
    'pooler_output' [B,H] (the batched-tensor branch), or a list of such
    dicts (the list-of-conversations branch); dropout-free inference.
    """
    # TODO(synk): the pretrained BertModel/RobertaModel/XLNetModel encoder has
    # no in-script Pallas equivalent; its outputs are taken as kernel inputs.
    def one(out):
        if mode == "cls":
            return _mapping_cls(out["pooler_output"], mapping_w, mapping_b)
        elif mode == "maxpooling":
            return _mapping_maxpool(out["last_hidden_state"], mapping_w, mapping_b)
        else:
            raise AssertionError("not support other operation")

    if isinstance(encoder_outputs, (list, tuple)):
        return [one(o) for o in encoder_outputs]
    return one(encoder_outputs)


def init_mapping(key, hidden_dim, out_dim):
    """nn.Linear(hidden_dim, out_dim) default init, stored as (in, out)."""
    k1, k2 = jax.random.split(key)
    bound = 1.0 / (hidden_dim ** 0.5)
    w = jax.random.uniform(k1, (hidden_dim, out_dim), jnp.float32, -bound, bound)
    b = jax.random.uniform(k2, (1, out_dim), jnp.float32, -bound, bound)
    return w, b


if __name__ == "__main__":
    # bert-base-uncased config: hidden_dim = 768; lane-dense out_dim = 128.
    B, S, H, D = 8, 16, 768, 128

    key = jax.random.PRNGKey(0)
    k_h, k_p, k_w, k_l = jax.random.split(key, 4)

    # Stand-ins for the pretrained encoder's outputs.
    last_hidden_state = jax.random.normal(k_h, (B, S, H), jnp.float32)
    pooler_output = jnp.tanh(jax.random.normal(k_p, (B, H), jnp.float32))
    w, b = init_mapping(k_w, H, D)

    enc_out = {"last_hidden_state": last_hidden_state,
               "pooler_output": pooler_output}

    # --- batched-tensor branch, both modes ---
    out_max = utterance_encoder_forward(enc_out, w, b, mode="maxpooling")
    out_cls = utterance_encoder_forward(enc_out, w, b, mode="cls")
    out_max, out_cls = jax.block_until_ready((out_max, out_cls))
    assert out_max.shape == (B, D) and out_cls.shape == (B, D)

    # Pure-JAX reference (bf16-matmul tolerance).
    ref_max = jnp.max(last_hidden_state, axis=1) @ w + b
    ref_cls = pooler_output @ w + b
    assert jnp.allclose(out_max, ref_max, atol=5e-2, rtol=5e-2)
    assert jnp.allclose(out_cls, ref_cls, atol=5e-2, rtol=5e-2)

    # --- list-of-conversations branch (variable lengths per conversation) ---
    k_a, k_b = jax.random.split(k_l)
    conv_outs = [
        {"last_hidden_state": jax.random.normal(k_a, (4, 8, H), jnp.float32),
         "pooler_output": jnp.tanh(jax.random.normal(k_a, (4, H), jnp.float32))},
        {"last_hidden_state": jax.random.normal(k_b, (6, 24, H), jnp.float32),
         "pooler_output": jnp.tanh(jax.random.normal(k_b, (6, H), jnp.float32))},
    ]
    outs_list = utterance_encoder_forward(conv_outs, w, b, mode="maxpooling")
    outs_list = jax.block_until_ready(outs_list)
    assert outs_list[0].shape == (4, D) and outs_list[1].shape == (6, D)
    ref0 = jnp.max(conv_outs[0]["last_hidden_state"], axis=1) @ w + b
    ref1 = jnp.max(conv_outs[1]["last_hidden_state"], axis=1) @ w + b
    assert jnp.allclose(outs_list[0], ref0, atol=5e-2, rtol=5e-2)
    assert jnp.allclose(outs_list[1], ref1, atol=5e-2, rtol=5e-2)

    finite = all(bool(jnp.all(jnp.isfinite(o)))
                 for o in [out_max, out_cls] + list(outs_list))
    assert finite
    print("KERNEL_OK")
</pallas_src>

<mosaic_0001>
module attributes {stable_mosaic.version = 11 : i64} {
  func.func @_maxpool_mapping_kernel(%arg0: i32, %arg1: i32, %arg2: memref<8x16x768xf32, #tpu.memory_space<vmem>>, %arg3: memref<768x128xf32, #tpu.memory_space<vmem>>, %arg4: memref<1x128xf32, #tpu.memory_space<vmem>>, %arg5: memref<8x128xf32, #tpu.memory_space<vmem>>, %arg6: memref<8x768xf32, #tpu.memory_space<vmem>>) attributes {dimension_semantics = [#tpu.dimension_semantics<parallel>, #tpu.dimension_semantics<arbitrary>], iteration_bounds = array<i64: 1, 1>, scalar_prefetch = 0 : i64, scratch_operands = 1 : i64, tpu.core_type = #tpu.core_type<tc>, window_params = [{transform_indices = @transform_0, window_bounds = array<i64: 8, 16, 768>}, {pipeline_mode = #tpu.pipeline_mode<synchronous>, transform_indices = @transform_1, window_bounds = array<i64: 768, 128>}, {pipeline_mode = #tpu.pipeline_mode<synchronous>, transform_indices = @transform_2, window_bounds = array<i64: 1, 128>}, {transform_indices = @transform_3, window_bounds = array<i64: 8, 128>}]} {
    %c0_i32 = arith.constant 0 : i32
    %0 = arith.cmpi eq, %arg1, %c0_i32 : i32
    %1 = arith.extui %0 : i1 to i32
    %c0_i32_0 = arith.constant 0 : i32
    %2 = arith.cmpi ne, %1, %c0_i32_0 : i32
    scf.if %2 {
      %cst_9 = arith.constant 0xFF800000 : f32
      %11 = vector.broadcast %cst_9 : f32 to vector<8x768xf32>
      %c0_10 = arith.constant 0 : index
      %c0_11 = arith.constant 0 : index
      %12 = vector.load %arg6[%c0_10, %c0_11] : memref<8x768xf32, #tpu.memory_space<vmem>>, vector<8x768xf32>
      tpu.vector_store %arg6[%c0_10, %c0_11], %11 {strides = array<i32>} : memref<8x768xf32, #tpu.memory_space<vmem>>, vector<8x768xf32>,
    } else {
    }
    %c0 = arith.constant 0 : index
    %c0_1 = arith.constant 0 : index
    %3 = vector.load %arg6[%c0, %c0_1] : memref<8x768xf32, #tpu.memory_space<vmem>>, vector<8x768xf32>
    %c0_2 = arith.constant 0 : index
    %c0_3 = arith.constant 0 : index
    %c0_4 = arith.constant 0 : index
    %4 = vector.load %arg2[%c0_2, %c0_3, %c0_4] : memref<8x16x768xf32, #tpu.memory_space<vmem>>, vector<8x16x768xf32>
    %cst = arith.constant dense<0xFF800000> : vector<8x768xf32>
    %5 = vector.multi_reduction <maximumf>, %4, %cst [1] : vector<8x16x768xf32> to vector<8x768xf32>
    %6 = arith.maximumf %3, %5 : vector<8x768xf32>
    %c0_5 = arith.constant 0 : index
    %c0_6 = arith.constant 0 : index
    %7 = vector.load %arg6[%c0_5, %c0_6] : memref<8x768xf32, #tpu.memory_space<vmem>>, vector<8x768xf32>
    tpu.vector_store %arg6[%c0_5, %c0_6], %6 {strides = array<i32>} : memref<8x768xf32, #tpu.memory_space<vmem>>, vector<8x768xf32>,
    %c0_i32_7 = arith.constant 0 : i32
    %8 = arith.cmpi eq, %arg1, %c0_i32_7 : i32
    %9 = arith.extui %8 : i1 to i32
    %c0_i32_8 = arith.constant 0 : i32
    %10 = arith.cmpi ne, %9, %c0_i32_8 : i32
    scf.if %10 {
      %c0_9 = arith.constant 0 : index
      %c0_10 = arith.constant 0 : index
      %11 = vector.load %arg6[%c0_9, %c0_10] : memref<8x768xf32, #tpu.memory_space<vmem>>, vector<8x768xf32>
      %12 = arith.truncf %11 : vector<8x768xf32> to vector<8x768xbf16>
      %c0_11 = arith.constant 0 : index
      %c0_12 = arith.constant 0 : index
      %13 = vector.load %arg3[%c0_11, %c0_12] : memref<768x128xf32, #tpu.memory_space<vmem>>, vector<768x128xf32>
      %14 = arith.truncf %13 : vector<768x128xf32> to vector<768x128xbf16>
      %cst_13 = arith.constant dense<0.000000e+00> : vector<8x128xf32>
      %15 = tpu.matmul %12, %14, %cst_13 {dimension_numbers = #tpu.dot_dimension_numbers<[1], [0], [0], [1], [0, 0, 1, 1], [], []>} : vector<8x768xbf16>, vector<768x128xbf16>, vector<8x128xf32> -> vector<8x128xf32>
      %c0_14 = arith.constant 0 : index
      %c0_15 = arith.constant 0 : index
      %16 = vector.load %arg4[%c0_14, %c0_15] : memref<1x128xf32, #tpu.memory_space<vmem>>, vector<1x128xf32>
      %17 = vector.broadcast %16 : vector<1x128xf32> to vector<8x128xf32>
      %18 = arith.addf %15, %17 : vector<8x128xf32>
      %c0_16 = arith.constant 0 : index
      %c0_17 = arith.constant 0 : index
      %19 = vector.load %arg5[%c0_16, %c0_17] : memref<8x128xf32, #tpu.memory_space<vmem>>, vector<8x128xf32>
      tpu.vector_store %arg5[%c0_16, %c0_17], %18 {strides = array<i32>} : memref<8x128xf32, #tpu.memory_space<vmem>>, vector<8x128xf32>,
    } else {
    }
    return
  }
  func.func @transform_0(%arg0: i32, %arg1: i32) -> (i32, i32, i32) {
    %c0_i32 = arith.constant 0 : i32
    %c0_i32_0 = arith.constant 0 : i32
    return %arg0, %arg1, %c0_i32 : i32, i32, i32
  }
  func.func @transform_1(%arg0: i32, %arg1: i32) -> (i32, i32) {
    %c0_i32 = arith.constant 0 : i32
    %c0_i32_0 = arith.constant 0 : i32
    %c0_i32_1 = arith.constant 0 : i32
    return %c0_i32, %c0_i32_0 : i32, i32
  }
  func.func @transform_2(%arg0: i32, %arg1: i32) -> (i32, i32) {
    %c0_i32 = arith.constant 0 : i32
    %c0_i32_0 = arith.constant 0 : i32
    %c0_i32_1 = arith.constant 0 : i32
    return %c0_i32, %c0_i32_0 : i32, i32
  }
  func.func @transform_3(%arg0: i32, %arg1: i32) -> (i32, i32) {
    %c0_i32 = arith.constant 0 : i32
    %c0_i32_0 = arith.constant 0 : i32
    return %arg0, %c0_i32 : i32, i32
  }
}

</mosaic_0001>

<bundles_post_ra>
// kernel: tpu_custom_call.1
= control target key start
LH: loop header
LB: loop body
LE: loop exit
PB: predicated region body
PF: predicated region fallthrough
CT: control target
= control target key end

     0   :  { %8 = vsyncpa [#allocation4], 0  ;;  %s1275_s0 = inlined_call_operand.hbm [shape: f32[8,16,768], index: 0, kind: input, shape index: {}]   ;;  %s1276_s1 = inlined_call_operand.hbm [shape: f32[768,128], index: 1, kind: input, shape index: {}]   ;;  %s1277_s2 = inlined_call_operand.vmem [shape: f32[1,128], index: 2, kind: input, shape index: {}]   ;;  %s1278_s3 = inlined_call_operand.hbm [shape: f32[8,128], index: 3, kind: output, shape index: {}]  }
   0x1   :  { %9 = vsyncpa [#allocation7], 0 }
   0x2   :  { %10 = vsyncpa [#allocation5], 0  ;;  %s1056_s12 = smov [#allocation3]   ;;  %s984_s16 = scalar_lea.hbm %s1275_s0, 12288 }
   0x3   :  { %s16_s13 = sshll.u32 %s1056_s12, 4  ;;  %p985_p0 = scmp.ne.s32.totalorder %s1275_s0, %s984_s16  ;;  %s17_s13 = int_to_ptr.vmem [resolvable:$true] %s16_s13 }
   0x4   :  { %p988_p1 = scmp.lt.u32.totalorder %s984_s16, %s1275_s0 }
   0x6   :  { %p990_p2 = pnand %p988_p1, %p985_p0 }
   0x8   :  { %993 = shalt.err (!%p990_p2)
}
   0x9   :  { %s994_s21 = scalar_lea.vmem %s17_s13, 12288  ;;  %p999_p4 = scmp.lt.s32.totalorder %s17_s13, %s17_s13 }
   0xa   :  { %p995_p3 = scmp.ne.s32.totalorder %s17_s13, %s994_s21  ;;  %p1000_p5 = scmp.lt.s32.totalorder %s994_s21, %s994_s21 }
   0xc   :  { %p1001_p6 = por %p1000_p5, %p999_p4 }
   0xe   :  { %p1002_p7 = pnand %p1001_p6, %p995_p3 }
  0x10   :  { %1005 = shalt.err (!%p1002_p7)
}
  0x11   :  { %s1057_s22 = smov 768   ;;  %s1058_s23 = smov 48  }
  0x12   :  { %22 = dma.hbm_to_vmem [thread:$0]  %s1275_s0, 12288, %s17_s13, [#allocation4], %s1057_s22, %s1057_s22, %s1058_s23  }
  0x13   :  { %s1059_s26 = smov [#allocation6]   ;;  %s1006_s30 = scalar_lea.hbm %s1276_s1, 12288 }
  0x14   :  { %s28_s27 = sshll.u32 %s1059_s26, 4  ;;  %p1007_p8 = scmp.ne.s32.totalorder %s1276_s1, %s1006_s30  ;;  %s29_s27 = int_to_ptr.vmem [resolvable:$true] %s28_s27 }
  0x15   :  { %p1010_p9 = scmp.lt.u32.totalorder %s1006_s30, %s1276_s1 }
  0x17   :  { %p1012_p10 = pnand %p1010_p9, %p1007_p8 }
  0x19   :  { %1015 = shalt.err (!%p1012_p10)
}
  0x1a   :  { %s1016_s8 = scalar_lea.vmem %s29_s27, 12288  ;;  %p1021_p12 = scmp.lt.s32.totalorder %s29_s27, %s29_s27 }
  0x1b   :  { %p1017_p11 = scmp.ne.s32.totalorder %s29_s27, %s1016_s8  ;;  %p1022_p13 = scmp.lt.s32.totalorder %s1016_s8, %s1016_s8 }
  0x1d   :  { %p1023_p0 = por %p1022_p13, %p1021_p12 }
  0x1f   :  { %p1024_p1 = pnand %p1023_p0, %p1017_p11 }
  0x21   :  { %1027 = shalt.err (!%p1024_p1)
}
  0x22   :  { %s1060_s0 = smov 128   ;;  %s1061_s9 = smov 8  }
  0x23   :  { %34 = dma.hbm_to_vmem [thread:$0]  %s1276_s1, 12288, %s29_s27, [#allocation7], %s1060_s0, %s1060_s0, %s1061_s9  }
  0x24   :  { %1050 = dma.done.wait [#allocation4], 12288  }
  0x25   :  { %1051 = vsyncadd [#allocation4], 4294955008 }
  0x26   :  { %1052 = dma.done.wait [#allocation7], 12288  }
  0x27   :  { %1053 = vsyncadd [#allocation7], 4294955008  ;;  %v638_v0 = vld [vmem:[#allocation6 + $0x80] sm:$0xff]  ;;  %v639_v1 = vld [vmem:[#allocation6 + $0x88] sm:$0xff]  ;;  %vm540_vm0 = vcmask 1041409   ;;  %vm542_vm1 = vcmask 1042434  }
  0x28   :  { %v622_v2 = vld [vmem:[#allocation6] sm:$0xff]  ;;  %v726_v3 = vpack.c.bf16 %v639_v1, %v638_v0  ;;  %v623_v4 = vld [vmem:[#allocation6 + $0x8] sm:$0xff]  ;;  %v640_v11 = vld [vmem:[#allocation6 + $0x90] sm:$0xff]  ;;  %vm544_vm2 = vcmask 1043459   ;;  %vm546_vm3 = vcmask 1044484   ;;  %vm548_vm4 = vcmask 1045509  }
  0x29   :  { %v670_v5 = vld [vmem:[#allocation6 + $0x180] sm:$0xff]  ;;  %v671_v6 = vld [vmem:[#allocation6 + $0x188] sm:$0xff]  ;;  %v718_v7 = vpack.c.bf16 %v623_v4, %v622_v2  ;;  %v641_v13 = vld [vmem:[#allocation6 + $0x98] sm:$0xff]  ;;  %vm550_vm5 = vcmask 1046534   ;;  %vm552_vm6 = vcmask 1047559   ;;  %s1062_s13 = smov [#allocation8]  }
  0x2a   :  { %v742_v8 = vpack.c.bf16 %v671_v6, %v670_v5  ;;  %v654_v9 = vld [vmem:[#allocation6 + $0x100] sm:$0xff]  ;;  %v655_v10 = vld [vmem:[#allocation6 + $0x108] sm:$0xff]  ;;  %911 = vmatprep.subr.bf16.mxu0 %v726_v3  ;;  %v624_v14 = vld [vmem:[#allocation6 + $0x10] sm:$0xff]  ;;  %v727_v16 = vpack.c.bf16 %v641_v13, %v640_v11  ;;  %s900_s14 = sshll.u32 %s1062_s13, 4  ;;  %s901_s14 = int_to_ptr.vmem [resolvable:$true] %s900_s14 }
  0x2b   :  { %v734_v12 = vpack.c.bf16 %v655_v10, %v654_v9  ;;  %v625_v15 = vld [vmem:[#allocation6 + $0x18] sm:$0xff]  ;;  %912 = vmatpush3.bf16.msra.mxu0 %v718_v7  ;;  %v672_v18 = vld [vmem:[#allocation6 + $0x190] sm:$0xff]  ;;  %v642_v23 = vld [vmem:[#allocation6 + $0xa0] sm:$0xff]  ;;  %s1028_s15 = scalar_lea.vmem %s901_s14, 128  ;;  %p1033_p3 = scmp.lt.s32.totalorder %s901_s14, %s901_s14 }
  0x2c   :  { %933 = vmatprep.subr.bf16.mxu1 %v742_v8  ;;  %v719_v17 = vpack.c.bf16 %v625_v15, %v624_v14  ;;  %v673_v19 = vld [vmem:[#allocation6 + $0x198] sm:$0xff]  ;;  %v656_v20 = vld [vmem:[#allocation6 + $0x110] sm:$0xff]  ;;  %v643_v24 = vld [vmem:[#allocation6 + $0xa8] sm:$0xff]  ;;  %913 = vmatprep.subr.bf16.mxu0 %v727_v16  ;;  %p1029_p2 = scmp.ne.s32.totalorder %s901_s14, %s1028_s15  ;;  %p1034_p4 = scmp.lt.s32.totalorder %s1028_s15, %s1028_s15 }
  0x2d   :  { %934 = vmatpush3.bf16.msra.mxu1 %v734_v12  ;;  %v743_v21 = vpack.c.bf16 %v673_v19, %v672_v18  ;;  %v657_v22 = vld [vmem:[#allocation6 + $0x118] sm:$0xff]  ;;  %v728_v26 = vpack.c.bf16 %v643_v24, %v642_v23  ;;  %v626_v27 = vld [vmem:[#allocation6 + $0x20] sm:$0xff]  ;;  %v627_v28 = vld [vmem:[#allocation6 + $0x28] sm:$0xff] }
  0x2e   :  { %v735_v25 = vpack.c.bf16 %v657_v22, %v656_v20  ;;  %v674_v29 = vld [vmem:[#allocation6 + $0x1a0] sm:$0xff]  ;;  %v675_v30 = vld [vmem:[#allocation6 + $0x1a8] sm:$0xff]  ;;  %v720_v33 = vpack.c.bf16 %v627_v28, %v626_v27  ;;  %v644_v35 = vld [vmem:[#allocation6 + $0xb0] sm:$0xff]  ;;  %p1035_p5 = por %p1034_p4, %p1033_p3 }
  0x2f   :  { %935 = vmatprep.subr.bf16.mxu1 %v743_v21  ;;  %v658_v31 = vld [vmem:[#allocation6 + $0x120] sm:$0xff]  ;;  %v659_v32 = vld [vmem:[#allocation6 + $0x128] sm:$0xff]  ;;  %914 = vmatpush3.bf16.msra.mxu0 %v719_v17  ;;  %v744_v34 = vpack.c.bf16 %v675_v30, %v674_v29  ;;  %v645_v36 = vld [vmem:[#allocation6 + $0xb8] sm:$0xff] }
  0x30   :  { %v628_v37 = vld [vmem:[#allocation6 + $0x30] sm:$0xff]  ;;  %915 = vmatprep.subr.bf16.mxu0 %v728_v26  ;;  %v736_v38 = vpack.c.bf16 %v659_v32, %v658_v31  ;;  %v729_v39 = vpack.c.bf16 %v645_v36, %v644_v35  ;;  %v629_v40 = vld [vmem:[#allocation6 + $0x38] sm:$0xff]  ;;  %v646_v46 = vld [vmem:[#allocation6 + $0xc0] sm:$0xff]  ;;  %p1036_p6 = pnand %p1035_p5, %p1029_p2 }
  0x31   :  { %936 = vmatpush3.bf16.msra.mxu1 %v735_v25  ;;  %v676_v41 = vld [vmem:[#allocation6 + $0x1b0] sm:$0xff]  ;;  %v677_v42 = vld [vmem:[#allocation6 + $0x1b8] sm:$0xff]  ;;  %v647_v47 = vld [vmem:[#allocation6 + $0xc8] sm:$0xff]  ;;  %v721_v48 = vpack.c.bf16 %v629_v40, %v628_v37 }
  0x32   :  { %937 = vmatprep.subr.bf16.mxu1 %v744_v34  ;;  %v745_v43 = vpack.c.bf16 %v677_v42, %v676_v41  ;;  %v660_v44 = vld [vmem:[#allocation6 + $0x130] sm:$0xff]  ;;  %v661_v45 = vld [vmem:[#allocation6 + $0x138] sm:$0xff]  ;;  %v678_v49 = vld [vmem:[#allocation6 + $0x1c0] sm:$0xff]  ;;  %v730_v52 = vpack.c.bf16 %v647_v47, %v646_v46 }
  0x33   :  { %916 = vmatpush3.bf16.msra.mxu0 %v720_v33  ;;  %v679_v50 = vld [vmem:[#allocation6 + $0x1c8] sm:$0xff]  ;;  %v737_v51 = vpack.c.bf16 %v661_v45, %v660_v44  ;;  %v630_v53 = vld [vmem:[#allocation6 + $0x40] sm:$0xff]  ;;  %v648_v58 = vld [vmem:[#allocation6 + $0xd0] sm:$0xff] }
  0x34   :  { %917 = vmatprep.subr.bf16.mxu0 %v729_v39  ;;  %v631_v54 = vld [vmem:[#allocation6 + $0x48] sm:$0xff]  ;;  %v662_v55 = vld [vmem:[#allocation6 + $0x140] sm:$0xff]  ;;  %v746_v56 = vpack.c.bf16 %v679_v50, %v678_v49  ;;  %v649_v59 = vld [vmem:[#allocation6 + $0xd8] sm:$0xff] }
  0x35   :  { %938 = vmatpush3.bf16.msra.mxu1 %v736_v38  ;;  %v663_v57 = vld [vmem:[#allocation6 + $0x148] sm:$0xff]  ;;  %v680_v60 = vld [vmem:[#allocation6 + $0x1d0] sm:$0xff]  ;;  %v681_v61 = vld [vmem:[#allocation6 + $0x1d8] sm:$0xff]  ;;  %v722_v62 = vpack.c.bf16 %v631_v54, %v630_v53  ;;  %v731_v3 = vpack.c.bf16 %v649_v59, %v648_v58 }
  0x36   :  { %939 = vmatprep.subr.bf16.mxu1 %v745_v43  ;;  %v632_v63 = vld [vmem:[#allocation6 + $0x50] sm:$0xff]  ;;  %v633_v0 = vld [vmem:[#allocation6 + $0x58] sm:$0xff]  ;;  %v738_v2 = vpack.c.bf16 %v663_v57, %v662_v55  ;;  %v650_v5 = vld [vmem:[#allocation6 + $0xe0] sm:$0xff]  ;;  %v747_v7 = vpack.c.bf16 %v681_v61, %v680_v60 }
  0x37   :  { %918 = vmatpush3.bf16.msra.mxu0 %v721_v48  ;;  %v664_v1 = vld [vmem:[#allocation6 + $0x150] sm:$0xff]  ;;  %v665_v4 = vld [vmem:[#allocation6 + $0x158] sm:$0xff]  ;;  %v651_v6 = vld [vmem:[#allocation6 + $0xe8] sm:$0xff]  ;;  %v723_v16 = vpack.c.bf16 %v633_v0, %v632_v63 }
  0x38   :  { %919 = vmatprep.subr.bf16.mxu0 %v730_v52  ;;  %v1107_v8 = vld [vmem:[#allocation6 + $0x60] sm:$0xff]  ;;  %v1109_v9 = vld [vmem:[#allocation6 + $0x68] sm:$0xff]  ;;  %v1115_v14 = vld [vmem:[#allocation6 + $0xf0] sm:$0xff]  ;;  %v739_v22 = vpack.c.bf16 %v665_v4, %v664_v1  ;;  %v732_v23 = vpack.c.bf16 %v651_v6, %v650_v5 }
  0x39   :  { %940 = vmatpush3.bf16.msra.mxu1 %v737_v51  ;;  %v682_v10 = vld [vmem:[#allocation6 + $0x1e0] sm:$0xff]  ;;  %v683_v11 = vld [vmem:[#allocation6 + $0x1e8] sm:$0xff]  ;;  %v1117_v15 = vld [vmem:[#allocation6 + $0xf8] sm:$0xff]  ;;  %v724_v33 = vpack.c.bf16 %v1109_v9, %v1107_v8 }
  0x3a   :  { %941 = vmatprep.subr.bf16.mxu1 %v746_v56  ;;  %v1111_v12 = vld [vmem:[#allocation6 + $0x160] sm:$0xff]  ;;  %v1113_v13 = vld [vmem:[#allocation6 + $0x168] sm:$0xff]  ;;  %v1119_v17 = vld [vmem:[#allocation6 + $0x70] sm:$0xff]  ;;  %v748_v27 = vpack.c.bf16 %v683_v11, %v682_v10  ;;  %v733_v35 = vpack.c.bf16 %v1117_v15, %v1115_v14 }
  0x3b   :  { %920 = vmatpush3.bf16.msra.mxu0 %v722_v62  ;;  %v1121_v18 = vld [vmem:[#allocation6 + $0x78] sm:$0xff]  ;;  %v1123_v19 = vld [vmem:[#allocation6 + $0x1f0] sm:$0xff]  ;;  %v61_v21 = vld [vmem:[#allocation3 + $0x8] sm:$0xff]  ;;  %v740_v34 = vpack.c.bf16 %v1113_v13, %v1111_v12 }
  0x3c   :  { %v1125_v20 = vld [vmem:[#allocation6 + $0x1f8] sm:$0xff]  ;;  %921 = vmatprep.subr.bf16.mxu0 %v731_v3  ;;  %v73_v25 = vld [vmem:[#allocation3 + $0x68] sm:$0xff]  ;;  %v725_v47 = vpack.c.bf16 %v1121_v18, %v1119_v17 }
  0x3d   :  { %942 = vmatpush3.bf16.msra.mxu1 %v738_v2  ;;  %v67_v24 = vld [vmem:[#allocation3 + $0x38] sm:$0xff]  ;;  %v85_v28 = vld [vmem:[#allocation3 + $0xc8] sm:$0xff]  ;;  %v749_v48 = vpack.c.bf16 %v1125_v20, %v1123_v19 }
  0x3e   :  { %v79_v26 = vld [vmem:[#allocation3 + $0x98] sm:$0xff]  ;;  %943 = vmatprep.subr.bf16.mxu1 %v747_v7  ;;  %v97_v30 = vld [vmem:[#allocation3 + $0x128] sm:$0xff]  ;;  %v163_v31 = vmax.f32 %v61_v21, %v67_v24 }
  0x3f   :  { %v91_v29 = vld [vmem:[#allocation3 + $0xf8] sm:$0xff]  ;;  %v205_v32 = vmax.f32 %v73_v25, %v79_v26  ;;  %v109_v37 = vld [vmem:[#allocation3 + $0x188] sm:$0xff]  ;;  %922 = vmatpush3.bf16.msra.mxu0 %v723_v16 }
  0x40   :  { %v103_v36 = vld [vmem:[#allocation3 + $0x158] sm:$0xff]  ;;  %v247_v39 = vmax.f32 %v85_v28, %v91_v29  ;;  %v121_v40 = vld [vmem:[#allocation3 + $0x1e8] sm:$0xff]  ;;  %v164_v43 = vrot.slane %v163_v31, 4  ;;  %923 = vmatprep.subr.bf16.mxu0 %v732_v23  ;;  %v60_v28 = vld [vmem:[#allocation3] sm:$0xff] }
  0x41   :  { %v115_v38 = vld [vmem:[#allocation3 + $0x1b8] sm:$0xff]  ;;  %v133_v42 = vld [vmem:[#allocation3 + $0x248] sm:$0xff]  ;;  %v206_v44 = vrot.slane %v205_v32, 4  ;;  %v289_v45 = vmax.f32 %v97_v30, %v103_v36  ;;  %944 = vmatpush3.bf16.msra.mxu1 %v739_v22  ;;  %v668_v22 = vld [vmem:[#allocation6 + $0x170] sm:$0xff] }
  0x42   :  { %v127_v41 = vld [vmem:[#allocation3 + $0x218] sm:$0xff]  ;;  %v331_v46 = vmax.f32 %v109_v37, %v115_v38  ;;  %v145_v50 = vld [vmem:[#allocation3 + $0x2a8] sm:$0xff]  ;;  %v248_v52 = vrot.slane %v247_v39, 4  ;;  %945 = vmatprep.subr.bf16.mxu1 %v748_v27  ;;  %v165_v54 = vmax.f32 %v163_v31, %v164_v43  ;;  %v66_v29 = vld [vmem:[#allocation3 + $0x30] sm:$0xff] }
  0x43   :  { %v139_v49 = vld [vmem:[#allocation3 + $0x278] sm:$0xff]  ;;  %v373_v53 = vmax.f32 %v121_v40, %v127_v41  ;;  %v207_v55 = vmax.f32 %v205_v32, %v206_v44  ;;  %v290_v56 = vrot.slane %v289_v45, 4  ;;  %924 = vmatpush3.bf16.msra.mxu0 %v724_v33  ;;  %v72_v30 = vld [vmem:[#allocation3 + $0x60] sm:$0xff]  ;;  %v90_v37 = vld [vmem:[#allocation3 + $0xf0] sm:$0xff] }
  0x44   :  { %v151_v51 = vld [vmem:[#allocation3 + $0x2d8] sm:$0xff]  ;;  %v332_v57 = vrot.slane %v331_v46, 4  ;;  %v249_v58 = vmax.f32 %v247_v39, %v248_v52  ;;  %v415_v60 = vmax.f32 %v133_v42, %v139_v49  ;;  %v166_v62 = vrot.slane %v165_v54, 2  ;;  %925 = vmatprep.subr.bf16.mxu0 %v733_v35  ;;  %v78_v35 = vld [vmem:[#allocation3 + $0x90] sm:$0xff]  ;;  %v84_v36 = vld [vmem:[#allocation3 + $0xc0] sm:$0xff] }
  0x45   :  { %v374_v59 = vrot.slane %v373_v53, 4  ;;  %v457_v61 = vmax.f32 %v145_v50, %v151_v51  ;;  %v208_v63 = vrot.slane %v207_v55, 2  ;;  %v291_v0 = vmax.f32 %v289_v45, %v290_v56  ;;  %946 = vmatpush3.bf16.msra.mxu1 %v740_v34  ;;  %v669_v23 = vld [vmem:[#allocation6 + $0x178] sm:$0xff]  ;;  %v96_v42 = vld [vmem:[#allocation3 + $0x120] sm:$0xff]  ;;  %v102_v43 = vld [vmem:[#allocation3 + $0x150] sm:$0xff] }
  0x46   :  { %v333_v1 = vmax.f32 %v331_v46, %v332_v57  ;;  %v250_v2 = vrot.slane %v249_v58, 2  ;;  %v416_v4 = vrot.slane %v415_v60, 4  ;;  %947 = vmatprep.subr.bf16.mxu1 %v749_v48  ;;  %v167_v6 = vmax.f32 %v165_v54, %v166_v62  ;;  %v108_v48 = vld [vmem:[#allocation3 + $0x180] sm:$0xff]  ;;  %v114_v50 = vld [vmem:[#allocation3 + $0x1b0] sm:$0xff] }
  0x47   :  { %v375_v3 = vmax.f32 %v373_v53, %v374_v59  ;;  %v458_v5 = vrot.slane %v457_v61, 4  ;;  %v209_v7 = vmax.f32 %v207_v55, %v208_v63  ;;  %v292_v8 = vrot.slane %v291_v0, 2  ;;  %926 = vmatpush3.bf16.msra.mxu0 %v725_v47  ;;  %v120_v51 = vld [vmem:[#allocation3 + $0x1e0] sm:$0xff]  ;;  %v126_v52 = vld [vmem:[#allocation3 + $0x210] sm:$0xff] }
  0x48   :  { %v334_v9 = vrot.slane %v333_v1, 2  ;;  %v251_v10 = vmax.f32 %v249_v58, %v250_v2  ;;  %v417_v12 = vmax.f32 %v415_v60, %v416_v4  ;;  %v168_v14 = vrot.slane %v167_v6, 1  ;;  %v138_v2 = vld [vmem:[#allocation3 + $0x270] sm:$0xff] }
  0x49   :  { %v376_v11 = vrot.slane %v375_v3, 2  ;;  %v459_v13 = vmax.f32 %v457_v61, %v458_v5  ;;  %v210_v15 = vrot.slane %v209_v7, 1  ;;  %v293_v16 = vmax.f32 %v291_v0, %v292_v8  ;;  %v150_v8 = vld [vmem:[#allocation3 + $0x2d0] sm:$0xff] }
  0x4a   :  { %v335_v17 = vmax.f32 %v333_v1, %v334_v9  ;;  %v252_v18 = vrot.slane %v251_v10, 1  ;;  %v418_v20 = vrot.slane %v417_v12, 2  ;;  %v169_v24 = vmax.f32 %v167_v6, %v168_v14  ;;  %v132_v1 = vld [vmem:[#allocation3 + $0x240] sm:$0xff] }
  0x4b   :  { %v377_v19 = vmax.f32 %v375_v3, %v376_v11  ;;  %v460_v21 = vrot.slane %v459_v13, 2  ;;  %v211_v25 = vmax.f32 %v209_v7, %v210_v15  ;;  %v294_v26 = vrot.slane %v293_v16, 1  ;;  %v144_v7 = vld [vmem:[#allocation3 + $0x2a0] sm:$0xff] }
  0x4c   :  { %v336_v27 = vrot.slane %v335_v17, 1  ;;  %v253_v31 = vmax.f32 %v251_v10, %v252_v18  ;;  %v419_v33 = vmax.f32 %v417_v12, %v418_v20  ;;  %v741_v41 = vpack.c.bf16 %v669_v23, %v668_v22 }
  0x4d   :  { %v378_v32 = vrot.slane %v377_v19, 1  ;;  %v461_v34 = vmax.f32 %v459_v13, %v460_v21  ;;  %v295_v38 = vmax.f32 %v293_v16, %v294_v26  ;;  %v554_v40 = vsel %vm540_vm0, %v211_v25, %v169_v24 }
  0x4e   :  { %v337_v39 = vmax.f32 %v335_v17, %v336_v27  ;;  %v420_v45 = vrot.slane %v419_v33, 1  ;;  %v555_v47 = vsel %vm542_vm1, %v253_v31, %v554_v40  ;;  %948 = vmatpush3.bf16.msra.mxu1 %v741_v41  ;;  %v156_v53 = vmax.f32 %v60_v28, %v66_v29  ;;  %v703_v41 = vld [vmem:[#allocation6 + $0x288] sm:$0xff] }
  0x4f   :  { %v379_v44 = vmax.f32 %v377_v19, %v378_v32  ;;  %v462_v46 = vrot.slane %v461_v34, 1  ;;  %v556_v49 = vsel %vm544_vm2, %v295_v38, %v555_v47  ;;  %v198_v54 = vmax.f32 %v72_v30, %v78_v35 }
  0x50   :  { %v240_v55 = vmax.f32 %v84_v36, %v90_v37  ;;  %v421_v56 = vmax.f32 %v419_v33, %v420_v45  ;;  %v557_v58 = vsel %vm546_vm3, %v337_v39, %v556_v49  ;;  %v282_v59 = vmax.f32 %v96_v42, %v102_v43  ;;  %v702_v36 = vld [vmem:[#allocation6 + $0x280] sm:$0xff]  ;;  %v63_v42 = vld [vmem:[#allocation3 + $0x18] sm:$0xff]  ;;  %v69_v43 = vld [vmem:[#allocation3 + $0x48] sm:$0xff] }
  0x51   :  { %v463_v57 = vmax.f32 %v461_v34, %v462_v46  ;;  %v558_v60 = vsel %vm548_vm4, %v379_v44, %v557_v58  ;;  %v157_v61 = vrot.slane %v156_v53, 4  ;;  %v199_v62 = vrot.slane %v198_v54, 4  ;;  %v93_v58 = vld [vmem:[#allocation3 + $0x108] sm:$0xff] }
  0x52   :  { %v241_v63 = vrot.slane %v240_v55, 4  ;;  %v559_v0 = vsel %vm550_vm5, %v421_v56, %v558_v60  ;;  %v283_v3 = vrot.slane %v282_v59, 4  ;;  %v324_v4 = vmax.f32 %v108_v48, %v114_v50  ;;  %v105_v60 = vld [vmem:[#allocation3 + $0x168] sm:$0xff] }
  0x53   :  { %v366_v5 = vmax.f32 %v120_v51, %v126_v52  ;;  %v560_v6 = vsel %vm552_vm6, %v463_v57, %v559_v0  ;;  %v158_v9 = vmax.f32 %v156_v53, %v157_v61  ;;  %v200_v10 = vmax.f32 %v198_v54, %v199_v62  ;;  %v75_v52 = vld [vmem:[#allocation3 + $0x78] sm:$0xff]  ;;  %v81_v53 = vld [vmem:[#allocation3 + $0xa8] sm:$0xff] }
  0x54   :  { %v242_v11 = vmax.f32 %v240_v55, %v241_v63  ;;  %v617_v12 = vpack.c.bf16 %v560_v6, %v560_v6  ;;  %v284_v13 = vmax.f32 %v282_v59, %v283_v3  ;;  %v325_v14 = vrot.slane %v324_v4, 4  ;;  %v87_v54 = vld [vmem:[#allocation3 + $0xd8] sm:$0xff] }
  0x55   :  { %v367_v15 = vrot.slane %v366_v5, 4  ;;  %v159_v16 = vrot.slane %v158_v9, 2  ;;  %v201_v17 = vrot.slane %v200_v10, 2  ;;  %v408_v19 = vmax.f32 %v132_v1, %v138_v2  ;;  %v99_v59 = vld [vmem:[#allocation3 + $0x138] sm:$0xff] }
  0x56   :  { %v243_v18 = vrot.slane %v242_v11, 2  ;;  %805 = vmatprep.mubr.bf16.mxu0 %v617_v12  ;;  %v285_v20 = vrot.slane %v284_v13, 2  ;;  %v326_v21 = vmax.f32 %v324_v4, %v325_v14  ;;  %v450_v23 = vmax.f32 %v144_v7, %v150_v8  ;;  %v111_v4 = vld [vmem:[#allocation3 + $0x198] sm:$0xff] }
  0x57   :  { %v368_v22 = vmax.f32 %v366_v5, %v367_v15  ;;  %v160_v24 = vmax.f32 %v158_v9, %v159_v16  ;;  %v202_v25 = vmax.f32 %v200_v10, %v201_v17  ;;  %v409_v27 = vrot.slane %v408_v19, 4  ;;  %v117_v5 = vld [vmem:[#allocation3 + $0x1c8] sm:$0xff]  ;;  %v123_v10 = vld [vmem:[#allocation3 + $0x1f8] sm:$0xff] }
  0x58   :  { %v244_v26 = vmax.f32 %v242_v11, %v243_v18  ;;  %v286_v28 = vmax.f32 %v284_v13, %v285_v20  ;;  %v327_v29 = vrot.slane %v326_v21, 2  ;;  %v451_v31 = vrot.slane %v450_v23, 4  ;;  %v129_v11 = vld [vmem:[#allocation3 + $0x228] sm:$0xff] }
  0x59   :  { %v369_v30 = vrot.slane %v368_v22, 2  ;;  %v161_v32 = vrot.slane %v160_v24, 1  ;;  %v203_v33 = vrot.slane %v202_v25, 1  ;;  %v410_v35 = vmax.f32 %v408_v19, %v409_v27 }
  0x5a   :  { %v245_v34 = vrot.slane %v244_v26, 1  ;;  %v287_v37 = vrot.slane %v286_v28, 1  ;;  %v328_v38 = vmax.f32 %v326_v21, %v327_v29  ;;  %v452_v40 = vmax.f32 %v450_v23, %v451_v31  ;;  %v135_v23 = vld [vmem:[#allocation3 + $0x258] sm:$0xff] }
  0x5b   :  { %v370_v39 = vmax.f32 %v368_v22, %v369_v30  ;;  %v162_v44 = vmax.f32 %v160_v24, %v161_v32  ;;  %v204_v45 = vmax.f32 %v202_v25, %v203_v33  ;;  %v411_v47 = vrot.slane %v410_v35, 2  ;;  %v141_v24 = vld [vmem:[#allocation3 + $0x288] sm:$0xff]  ;;  %v147_v29 = vld [vmem:[#allocation3 + $0x2b8] sm:$0xff] }
  0x5c   :  { %v246_v46 = vmax.f32 %v244_v26, %v245_v34  ;;  %v288_v48 = vmax.f32 %v286_v28, %v287_v37  ;;  %v329_v49 = vrot.slane %v328_v38, 1  ;;  %v453_v51 = vrot.slane %v452_v40, 2  ;;  %v153_v30 = vld [vmem:[#allocation3 + $0x2e8] sm:$0xff] }
  0x5d   :  { %v371_v50 = vrot.slane %v370_v39, 1  ;;  %v412_v55 = vmax.f32 %v410_v35, %v411_v47  ;;  %v541_v56 = vsel %vm540_vm0, %v204_v45, %v162_v44  ;;  %v758_v57 = vpack.c.bf16 %v703_v41, %v702_v36 }
  0x5e   :  { %v177_v61 = vmax.f32 %v63_v42, %v69_v43  ;;  %v330_v62 = vmax.f32 %v328_v38, %v329_v49  ;;  %v454_v0 = vmax.f32 %v452_v40, %v453_v51  ;;  %v543_v1 = vsel %vm542_vm1, %v246_v46, %v541_v56  ;;  %v687_v51 = vld [vmem:[#allocation6 + $0x208] sm:$0xff] }
  0x5f   :  { %v372_v63 = vmax.f32 %v370_v39, %v371_v50  ;;  %v413_v2 = vrot.slane %v412_v55, 1  ;;  %v545_v3 = vsel %vm544_vm2, %v288_v48, %v543_v1  ;;  %955 = vmatprep.subr.bf16.mxu0 %v758_v57  ;;  %v219_v7 = vmax.f32 %v75_v52, %v81_v53  ;;  %v686_v50 = vld [vmem:[#allocation6 + $0x200] sm:$0xff] }
  0x60   :  { %v178_v6 = vrot.slane %v177_v61, 4  ;;  %v455_v8 = vrot.slane %v454_v0, 1  ;;  %v547_v9 = vsel %vm546_vm3, %v330_v62, %v545_v3  ;;  %v261_v12 = vmax.f32 %v87_v54, %v93_v58  ;;  %v80_v3 = vld [vmem:[#allocation3 + $0xa0] sm:$0xff] }
  0x61   :  { %v303_v13 = vmax.f32 %v99_v59, %v105_v60  ;;  %v414_v14 = vmax.f32 %v412_v55, %v413_v2  ;;  %v549_v15 = vsel %vm548_vm4, %v372_v63, %v547_v9  ;;  %v220_v17 = vrot.slane %v219_v7, 4  ;;  %v62_v60 = vld [vmem:[#allocation3 + $0x10] sm:$0xff] }
  0x62   :  { %v179_v16 = vmax.f32 %v177_v61, %v178_v6  ;;  %v456_v18 = vmax.f32 %v454_v0, %v455_v8  ;;  %v262_v19 = vrot.slane %v261_v12, 4  ;;  %v345_v21 = vmax.f32 %v111_v4, %v117_v5  ;;  %v68_v61 = vld [vmem:[#allocation3 + $0x40] sm:$0xff]  ;;  %v74_v2 = vld [vmem:[#allocation3 + $0x70] sm:$0xff] }
  0x63   :  { %v304_v20 = vrot.slane %v303_v13, 4  ;;  %v551_v22 = vsel %vm550_vm5, %v414_v14, %v549_v15  ;;  %v221_v26 = vmax.f32 %v219_v7, %v220_v17  ;;  %v387_v27 = vmax.f32 %v123_v10, %v129_v11  ;;  %v86_v11 = vld [vmem:[#allocation3 + $0xd0] sm:$0xff] }
  0x64   :  { %v180_v25 = vrot.slane %v179_v16, 2  ;;  %v553_v28 = vsel %vm552_vm6, %v456_v18, %v551_v22  ;;  %v263_v31 = vmax.f32 %v261_v12, %v262_v19  ;;  %v346_v33 = vrot.slane %v345_v21, 4  ;;  %v92_v12 = vld [vmem:[#allocation3 + $0x100] sm:$0xff]  ;;  %v98_v17 = vld [vmem:[#allocation3 + $0x130] sm:$0xff] }
  0x65   :  { %v305_v32 = vmax.f32 %v303_v13, %v304_v20  ;;  %v616_v34 = vpack.c.bf16 %v553_v28, %v553_v28  ;;  %v222_v36 = vrot.slane %v221_v26, 2  ;;  %v388_v37 = vrot.slane %v387_v27, 4  ;;  %v104_v18 = vld [vmem:[#allocation3 + $0x160] sm:$0xff]  ;;  %v122_v28 = vld [vmem:[#allocation3 + $0x1f0] sm:$0xff] }
  0x66   :  { %v181_v35 = vmax.f32 %v179_v16, %v180_v25  ;;  %v264_v38 = vrot.slane %v263_v31, 2  ;;  %v347_v40 = vmax.f32 %v345_v21, %v346_v33  ;;  %v429_v41 = vmax.f32 %v135_v23, %v141_v24  ;;  %v110_v23 = vld [vmem:[#allocation3 + $0x190] sm:$0xff]  ;;  %v116_v24 = vld [vmem:[#allocation3 + $0x1c0] sm:$0xff] }
  0x67   :  { %v306_v39 = vrot.slane %v305_v32, 2  ;;  %806 = vmatmul.mubr.bf16.vlgmr.msra.gmra.mrb[0].mxu0 %v616_v34  ;;  %v223_v43 = vmax.f32 %v221_v26, %v222_v36  ;;  %v389_v44 = vmax.f32 %v387_v27, %v388_v37  ;;  %v471_v45 = vmax.f32 %v147_v29, %v153_v30  ;;  %v128_v29 = vld [vmem:[#allocation3 + $0x220] sm:$0xff] }
  0x68   :  { %v182_v42 = vrot.slane %v181_v35, 1  ;;  %v265_v46 = vmax.f32 %v263_v31, %v264_v38  ;;  %v348_v48 = vrot.slane %v347_v40, 2  ;;  %v430_v49 = vrot.slane %v429_v41, 4 }
  0x69   :  { %v307_v47 = vmax.f32 %v305_v32, %v306_v39  ;;  %v224_v53 = vrot.slane %v223_v43, 1  ;;  %v390_v54 = vrot.slane %v389_v44, 2  ;;  %v472_v55 = vrot.slane %v471_v45, 4 }
  0x6a   :  { %v183_v52 = vmax.f32 %v181_v35, %v182_v42  ;;  %v266_v56 = vrot.slane %v265_v46, 1  ;;  %v349_v58 = vmax.f32 %v347_v40, %v348_v48  ;;  %v431_v59 = vmax.f32 %v429_v41, %v430_v49 }
  0x6b   :  { %v308_v57 = vrot.slane %v307_v47, 1  ;;  %v225_v62 = vmax.f32 %v223_v43, %v224_v53  ;;  %v391_v63 = vmax.f32 %v389_v44, %v390_v54  ;;  %v473_v0 = vmax.f32 %v471_v45, %v472_v55  ;;  %v134_v45 = vld [vmem:[#allocation3 + $0x250] sm:$0xff] }
  0x6c   :  { %v750_v1 = vpack.c.bf16 %v687_v51, %v686_v50  ;;  %v267_v4 = vmax.f32 %v265_v46, %v266_v56  ;;  %v350_v6 = vrot.slane %v349_v58, 1  ;;  %v432_v7 = vrot.slane %v431_v59, 2  ;;  %v140_v46 = vld [vmem:[#allocation3 + $0x280] sm:$0xff]  ;;  %v146_v51 = vld [vmem:[#allocation3 + $0x2b0] sm:$0xff] }
  0x6d   :  { %v309_v5 = vmax.f32 %v307_v47, %v308_v57  ;;  %v392_v8 = vrot.slane %v391_v63, 1  ;;  %v474_v9 = vrot.slane %v473_v0, 2  ;;  %v568_v10 = vsel %vm540_vm0, %v225_v62, %v183_v52  ;;  %v152_v52 = vld [vmem:[#allocation3 + $0x2e0] sm:$0xff] }
  0x6e   :  { %956 = vmatpush3.bf16.msra.mxu0 %v750_v1  ;;  %v170_v13 = vmax.f32 %v62_v60, %v68_v61  ;;  %v351_v14 = vmax.f32 %v349_v58, %v350_v6  ;;  %v433_v15 = vmax.f32 %v431_v59, %v432_v7  ;;  %v569_v16 = vsel %vm542_vm1, %v267_v4, %v568_v10  ;;  %v704_v4 = vld [vmem:[#allocation6 + $0x290] sm:$0xff] }
  0x6f   :  { %v212_v19 = vmax.f32 %v74_v2, %v80_v3  ;;  %v393_v20 = vmax.f32 %v391_v63, %v392_v8  ;;  %v475_v21 = vmax.f32 %v473_v0, %v474_v9  ;;  %v570_v22 = vsel %vm544_vm2, %v309_v5, %v569_v16  ;;  %v705_v5 = vld [vmem:[#allocation6 + $0x298] sm:$0xff]  ;;  %v688_v10 = vld [vmem:[#allocation6 + $0x210] sm:$0xff] }
  0x70   :  { %v171_v25 = vrot.slane %v170_v13, 4  ;;  %v434_v26 = vrot.slane %v433_v15, 1  ;;  %v571_v27 = vsel %vm546_vm3, %v351_v14, %v570_v22  ;;  %v254_v31 = vmax.f32 %v86_v11, %v92_v12  ;;  %v689_v11 = vld [vmem:[#allocation6 + $0x218] sm:$0xff]  ;;  %v706_v12 = vld [vmem:[#allocation6 + $0x2a0] sm:$0xff] }
  0x71   :  { %v213_v30 = vrot.slane %v212_v19, 4  ;;  %v476_v32 = vrot.slane %v475_v21, 1  ;;  %v572_v33 = vsel %vm548_vm4, %v393_v20, %v571_v27  ;;  %v296_v35 = vmax.f32 %v98_v17, %v104_v18  ;;  %v707_v17 = vld [vmem:[#allocation6 + $0x2a8] sm:$0xff]  ;;  %v1158_v18 = vld [vmem:[#allocation6 + $0x220] sm:$0xff]  ;;  %v1168_v27 = vld [vmem:[#allocation6 + $0x238] sm:$0xff] }
  0x72   :  { %v172_v34 = vmax.f32 %v170_v13, %v171_v25  ;;  %v435_v36 = vmax.f32 %v433_v15, %v434_v26  ;;  %v255_v38 = vrot.slane %v254_v31, 4  ;;  %v338_v39 = vmax.f32 %v110_v23, %v116_v24  ;;  %v1162_v24 = vld [vmem:[#allocation6 + $0x2b0] sm:$0xff]  ;;  %v1164_v25 = vld [vmem:[#allocation6 + $0x2b8] sm:$0xff] }
  0x73   :  { %v214_v37 = vmax.f32 %v212_v19, %v213_v30  ;;  %v477_v40 = vmax.f32 %v475_v21, %v476_v32  ;;  %v297_v42 = vrot.slane %v296_v35, 4  ;;  %v380_v43 = vmax.f32 %v122_v28, %v128_v29  ;;  %v1160_v19 = vld [vmem:[#allocation6 + $0x228] sm:$0xff]  ;;  %v1166_v26 = vld [vmem:[#allocation6 + $0x230] sm:$0xff]  ;;  %v1171_v32 = vld [vmem:[#allocation6 + $0x2c0] sm:$0xff] }
  0x74   :  { %v173_v41 = vrot.slane %v172_v34, 2  ;;  %v573_v44 = vsel %vm550_vm5, %v435_v36, %v572_v33  ;;  %v256_v48 = vmax.f32 %v254_v31, %v255_v38  ;;  %v339_v49 = vrot.slane %v338_v39, 4  ;;  %v1173_v33 = vld [vmem:[#allocation6 + $0x2c8] sm:$0xff] }
  0x75   :  { %v215_v47 = vrot.slane %v214_v37, 2  ;;  %v574_v50 = vsel %vm552_vm6, %v477_v40, %v573_v44  ;;  %v298_v54 = vmax.f32 %v296_v35, %v297_v42  ;;  %v381_v55 = vrot.slane %v380_v43, 4  ;;  %v1177_v35 = vld [vmem:[#allocation6 + $0x248] sm:$0xff]  ;;  %v1179_v40 = vld [vmem:[#allocation6 + $0x2d0] sm:$0xff]  ;;  %v1187_v44 = vld [vmem:[#allocation6 + $0x2e0] sm:$0xff] }
  0x76   :  { %v174_v53 = vmax.f32 %v172_v34, %v173_v41  ;;  %v619_v56 = vpack.c.bf16 %v574_v50, %v574_v50  ;;  %v257_v58 = vrot.slane %v256_v48, 2  ;;  %v340_v59 = vmax.f32 %v338_v39, %v339_v49  ;;  %v1175_v34 = vld [vmem:[#allocation6 + $0x240] sm:$0xff]  ;;  %v1181_v41 = vld [vmem:[#allocation6 + $0x2d8] sm:$0xff]  ;;  %v1183_v42 = vld [vmem:[#allocation6 + $0x250] sm:$0xff] }
  0x77   :  { %v216_v57 = vmax.f32 %v214_v37, %v215_v47  ;;  %v299_v61 = vrot.slane %v298_v54, 2  ;;  %v382_v62 = vmax.f32 %v380_v43, %v381_v55  ;;  %v422_v63 = vmax.f32 %v134_v45, %v140_v46  ;;  %v1185_v43 = vld [vmem:[#allocation6 + $0x258] sm:$0xff]  ;;  %v1189_v45 = vld [vmem:[#allocation6 + $0x2e8] sm:$0xff]  ;;  %v1192_v50 = vld [vmem:[#allocation6 + $0x260] sm:$0xff] }
  0x78   :  { %v175_v60 = vrot.slane %v174_v53, 1  ;;  %845 = vmatprep.mubr.bf16.mxu1 %v619_v56  ;;  %v258_v1 = vmax.f32 %v256_v48, %v257_v58  ;;  %v341_v2 = vrot.slane %v340_v59, 2  ;;  %v464_v3 = vmax.f32 %v146_v51, %v152_v52  ;;  %v1194_v51 = vld [vmem:[#allocation6 + $0x268] sm:$0xff]  ;;  %v1196_v52 = vld [vmem:[#allocation6 + $0x2f0] sm:$0xff]  ;;  %v1202_v55 = vld [vmem:[#allocation6 + $0x278] sm:$0xff] }
  0x79   :  { %v217_v0 = vrot.slane %v216_v57, 1  ;;  %v300_v7 = vmax.f32 %v298_v54, %v299_v61  ;;  %v383_v8 = vrot.slane %v382_v62, 2  ;;  %v423_v9 = vrot.slane %v422_v63, 4  ;;  %v1200_v54 = vld [vmem:[#allocation6 + $0x270] sm:$0xff]  ;;  %v71_v61 = vld [vmem:[#allocation3 + $0x58] sm:$0xff] }
  0x7a   :  { %v176_v6 = vmax.f32 %v174_v53, %v175_v60  ;;  %v259_v14 = vrot.slane %v258_v1, 1  ;;  %v342_v15 = vmax.f32 %v340_v59, %v341_v2  ;;  %v465_v16 = vrot.slane %v464_v3, 4  ;;  %v1198_v53 = vld [vmem:[#allocation6 + $0x2f8] sm:$0xff]  ;;  %v65_v60 = vld [vmem:[#allocation3 + $0x28] sm:$0xff] }
  0x7b   :  { %v218_v13 = vmax.f32 %v216_v57, %v217_v0  ;;  %v301_v20 = vrot.slane %v300_v7, 1  ;;  %v384_v21 = vmax.f32 %v382_v62, %v383_v8  ;;  %v424_v22 = vmax.f32 %v422_v63, %v423_v9  ;;  %v77_v62 = vld [vmem:[#allocation3 + $0x88] sm:$0xff] }
  0x7c   :  { %v759_v23 = vpack.c.bf16 %v705_v5, %v704_v4  ;;  %v260_v28 = vmax.f32 %v258_v1, %v259_v14  ;;  %v343_v29 = vrot.slane %v342_v15, 1  ;;  %v466_v30 = vmax.f32 %v464_v3, %v465_v16  ;;  %v83_v3 = vld [vmem:[#allocation3 + $0xb8] sm:$0xff]  ;;  %v89_v4 = vld [vmem:[#allocation3 + $0xe8] sm:$0xff] }
  0x7d   :  { %v561_v31 = vsel %vm540_vm0, %v218_v13, %v176_v6  ;;  %v302_v36 = vmax.f32 %v300_v7, %v301_v20  ;;  %v385_v37 = vrot.slane %v384_v21, 1  ;;  %v425_v38 = vrot.slane %v424_v22, 2  ;;  %v95_v5 = vld [vmem:[#allocation3 + $0x118] sm:$0xff] }
  0x7e   :  { %957 = vmatprep.subr.bf16.mxu0 %v759_v23  ;;  %v751_v39 = vpack.c.bf16 %v689_v11, %v688_v10  ;;  %v344_v46 = vmax.f32 %v342_v15, %v343_v29  ;;  %v467_v47 = vrot.slane %v466_v30, 2  ;;  %v562_v48 = vsel %vm542_vm1, %v260_v28, %v561_v31  ;;  %v101_v10 = vld [vmem:[#allocation3 + $0x148] sm:$0xff]  ;;  %v107_v11 = vld [vmem:[#allocation3 + $0x178] sm:$0xff] }
  0x7f   :  { %v760_v49 = vpack.c.bf16 %v707_v17, %v706_v12  ;;  %v386_v56 = vmax.f32 %v384_v21, %v385_v37  ;;  %v426_v57 = vmax.f32 %v424_v22, %v425_v38  ;;  %v563_v58 = vsel %vm544_vm2, %v302_v36, %v562_v48  ;;  %v113_v12 = vld [vmem:[#allocation3 + $0x1a8] sm:$0xff]  ;;  %v119_v17 = vld [vmem:[#allocation3 + $0x1d8] sm:$0xff] }
  0x80   :  { %958 = vmatpush3.bf16.msra.mxu0 %v751_v39  ;;  %v752_v59 = vpack.c.bf16 %v1160_v19, %v1158_v18  ;;  %v468_v63 = vmax.f32 %v466_v30, %v467_v47  ;;  %v564_v0 = vsel %vm546_vm3, %v344_v46, %v563_v58  ;;  %v761_v1 = vpack.c.bf16 %v1164_v25, %v1162_v24  ;;  %v125_v18 = vld [vmem:[#allocation3 + $0x208] sm:$0xff]  ;;  %v131_v19 = vld [vmem:[#allocation3 + $0x238] sm:$0xff] }
  0x81   :  { %959 = vmatprep.subr.bf16.mxu0 %v760_v49  ;;  %v753_v2 = vpack.c.bf16 %v1168_v27, %v1166_v26  ;;  %v427_v6 = vrot.slane %v426_v57, 1  ;;  %v565_v7 = vsel %vm548_vm4, %v386_v56, %v564_v0  ;;  %v762_v8 = vpack.c.bf16 %v1173_v33, %v1171_v32  ;;  %v137_v29 = vld [vmem:[#allocation3 + $0x268] sm:$0xff]  ;;  %v143_v30 = vld [vmem:[#allocation3 + $0x298] sm:$0xff] }
  0x82   :  { %v754_v9 = vpack.c.bf16 %v1177_v35, %v1175_v34  ;;  %v469_v13 = vrot.slane %v468_v63, 1  ;;  %v763_v14 = vpack.c.bf16 %v1181_v41, %v1179_v40  ;;  %v755_v15 = vpack.c.bf16 %v1185_v43, %v1183_v42  ;;  %v149_v35 = vld [vmem:[#allocation3 + $0x2c8] sm:$0xff]  ;;  %v155_v36 = vld [vmem:[#allocation3 + $0x2f8] sm:$0xff] }
  0x83   :  { %v764_v16 = vpack.c.bf16 %v1189_v45, %v1187_v44  ;;  %v428_v20 = vmax.f32 %v426_v57, %v427_v6  ;;  %v756_v21 = vpack.c.bf16 %v1194_v51, %v1192_v50  ;;  %v765_v22 = vpack.c.bf16 %v1198_v53, %v1196_v52  ;;  %v136_v53 = vld [vmem:[#allocation3 + $0x260] sm:$0xff] }
  0x84   :  { %960 = vmatpush3.bf16.msra.mxu0 %v752_v59  ;;  %v757_v23 = vpack.c.bf16 %v1202_v55, %v1200_v54  ;;  %v470_v24 = vmax.f32 %v468_v63, %v469_v13  ;;  %v191_v25 = vmax.f32 %v65_v60, %v71_v61  ;;  %v233_v26 = vmax.f32 %v77_v62, %v83_v3 }
  0x85   :  { %961 = vmatprep.subr.bf16.mxu0 %v761_v1  ;;  %v275_v27 = vmax.f32 %v89_v4, %v95_v5  ;;  %v566_v28 = vsel %vm550_vm5, %v428_v20, %v565_v7  ;;  %v317_v31 = vmax.f32 %v101_v10, %v107_v11  ;;  %v359_v32 = vmax.f32 %v113_v12, %v119_v17 }
  0x86   :  { %v401_v33 = vmax.f32 %v125_v18, %v131_v19  ;;  %v567_v34 = vsel %vm552_vm6, %v470_v24, %v566_v28  ;;  %v192_v37 = vrot.slane %v191_v25, 4  ;;  %v234_v38 = vrot.slane %v233_v26, 4  ;;  %v64_v18 = vld [vmem:[#allocation3 + $0x20] sm:$0xff] }
  0x87   :  { %v276_v39 = vrot.slane %v275_v27, 4  ;;  %v618_v40 = vpack.c.bf16 %v567_v34, %v567_v34  ;;  %v318_v41 = vrot.slane %v317_v31, 4  ;;  %v360_v46 = vrot.slane %v359_v32, 4 }
  0x88   :  { %962 = vmatpush3.bf16.msra.mxu0 %v753_v2  ;;  %v402_v47 = vrot.slane %v401_v33, 4  ;;  %v193_v48 = vmax.f32 %v191_v25, %v192_v37  ;;  %v235_v49 = vmax.f32 %v233_v26, %v234_v38  ;;  %v443_v57 = vmax.f32 %v137_v29, %v143_v30  ;;  %v70_v26 = vld [vmem:[#allocation3 + $0x50] sm:$0xff]  ;;  %v100_v37 = vld [vmem:[#allocation3 + $0x140] sm:$0xff] }
  0x89   :  { %963 = vmatprep.subr.bf16.mxu0 %v762_v8  ;;  %v277_v56 = vmax.f32 %v275_v27, %v276_v39  ;;  %846 = vmatmul.mubr.bf16.vlgmr.msra.gmra.mrb[0].mxu1 %v618_v40  ;;  %v319_v58 = vmax.f32 %v317_v31, %v318_v41  ;;  %v361_v59 = vmax.f32 %v359_v32, %v360_v46  ;;  %v82_v30 = vld [vmem:[#allocation3 + $0xb0] sm:$0xff]  ;;  %v88_v31 = vld [vmem:[#allocation3 + $0xe0] sm:$0xff] }
  0x8a   :  { %v403_v60 = vmax.f32 %v401_v33, %v402_v47  ;;  %v485_v61 = vmax.f32 %v149_v35, %v155_v36  ;;  %v194_v62 = vrot.slane %v193_v48, 2  ;;  %v236_v63 = vrot.slane %v235_v49, 2  ;;  %v94_v36 = vld [vmem:[#allocation3 + $0x110] sm:$0xff] }
  0x8b   :  { %v278_v0 = vrot.slane %v277_v56, 2  ;;  %v444_v1 = vrot.slane %v443_v57, 4  ;;  %v320_v3 = vrot.slane %v319_v58, 2  ;;  %v362_v2 = vrot.slane %v361_v59, 2  ;;  %v106_v38 = vld [vmem:[#allocation3 + $0x170] sm:$0xff] }
  0x8c   :  { %964 = vmatpush3.bf16.msra.mxu0 %v754_v9  ;;  %v404_v4 = vrot.slane %v403_v60, 2  ;;  %v486_v5 = vrot.slane %v485_v61, 4  ;;  %v195_v6 = vmax.f32 %v193_v48, %v194_v62  ;;  %v237_v7 = vmax.f32 %v235_v49, %v236_v63  ;;  %v76_v9 = vld [vmem:[#allocation3 + $0x80] sm:$0xff]  ;;  %v118_v48 = vld [vmem:[#allocation3 + $0x1d0] sm:$0xff] }
  0x8d   :  { %965 = vmatprep.subr.bf16.mxu0 %v763_v14  ;;  %v279_v8 = vmax.f32 %v277_v56, %v278_v0  ;;  %v445_v10 = vmax.f32 %v443_v57, %v444_v1  ;;  %v321_v11 = vmax.f32 %v319_v58, %v320_v3  ;;  %v363_v12 = vmax.f32 %v361_v59, %v362_v2  ;;  %v124_v59 = vld [vmem:[#allocation3 + $0x200] sm:$0xff] }
  0x8e   :  { %v405_v13 = vmax.f32 %v403_v60, %v404_v4  ;;  %v487_v17 = vmax.f32 %v485_v61, %v486_v5  ;;  %v196_v19 = vrot.slane %v195_v6, 1  ;;  %v238_v20 = vrot.slane %v237_v7, 1  ;;  %v130_v60 = vld [vmem:[#allocation3 + $0x230] sm:$0xff] }
  0x8f   :  { %v280_v24 = vrot.slane %v279_v8, 1  ;;  %v446_v25 = vrot.slane %v445_v10, 2  ;;  %v322_v14 = vrot.slane %v321_v11, 1  ;;  %v364_v27 = vrot.slane %v363_v12, 1 }
  0x90   :  { %966 = vmatpush3.bf16.msra.mxu0 %v755_v15  ;;  %v406_v28 = vrot.slane %v405_v13, 1  ;;  %v488_v29 = vrot.slane %v487_v17, 2  ;;  %v197_v32 = vmax.f32 %v195_v6, %v196_v19  ;;  %v239_v33 = vmax.f32 %v237_v7, %v238_v20 }
  0x91   :  { %967 = vmatprep.subr.bf16.mxu0 %v764_v16  ;;  %v281_v34 = vmax.f32 %v279_v8, %v280_v24  ;;  %v447_v35 = vmax.f32 %v445_v10, %v446_v25  ;;  %v323_v39 = vmax.f32 %v321_v11, %v322_v14  ;;  %v365_v42 = vmax.f32 %v363_v12, %v364_v27  ;;  %v112_v16 = vld [vmem:[#allocation3 + $0x1a0] sm:$0xff]  ;;  %v154_v10 = vld [vmem:[#allocation3 + $0x2f0] sm:$0xff] }
  0x92   :  { %v407_v43 = vmax.f32 %v405_v13, %v406_v28  ;;  %v489_v15 = vmax.f32 %v487_v17, %v488_v29  ;;  %v582_v41 = vsel %vm540_vm0, %v239_v33, %v197_v32  ;;  %v184_v46 = vmax.f32 %v64_v18, %v70_v26  ;;  %v148_v8 = vld [vmem:[#allocation3 + $0x2c0] sm:$0xff] }
  0x93   :  { %v448_v40 = vrot.slane %v447_v35, 1  ;;  %v226_v47 = vmax.f32 %v76_v9, %v82_v30  ;;  %v583_v45 = vsel %vm542_vm1, %v281_v34, %v582_v41  ;;  %v268_v49 = vmax.f32 %v88_v31, %v94_v36 }
  0x94   :  { %968 = vmatpush3.bf16.msra.mxu0 %v756_v21  ;;  %v490_v44 = vrot.slane %v489_v15, 1  ;;  %v310_v56 = vmax.f32 %v100_v37, %v106_v38  ;;  %v584_v58 = vsel %vm544_vm2, %v323_v39, %v583_v45  ;;  %v185_v61 = vrot.slane %v184_v46, 4 }
  0x95   :  { %969 = vmatprep.subr.bf16.mxu0 %v765_v22  ;;  %v449_v57 = vmax.f32 %v447_v35, %v448_v40  ;;  %v227_v62 = vrot.slane %v226_v47, 4  ;;  %v585_v51 = vsel %vm546_vm3, %v365_v42, %v584_v58  ;;  %v269_v21 = vrot.slane %v268_v49, 4  ;;  %v142_v22 = vld [vmem:[#allocation3 + $0x290] sm:$0xff] }
  0x96   :  { %v491_v50 = vmax.f32 %v489_v15, %v490_v44  ;;  %v311_v63 = vrot.slane %v310_v56, 4  ;;  %v586_v0 = vsel %vm548_vm4, %v407_v43, %v585_v51  ;;  %v186_v1 = vmax.f32 %v184_v46, %v185_v61 }
  0x97   :  { %v228_v3 = vmax.f32 %v226_v47, %v227_v62  ;;  %v352_v2 = vmax.f32 %v112_v16, %v118_v48  ;;  %v587_v52 = vsel %vm550_vm5, %v449_v57, %v586_v0  ;;  %v270_v4 = vmax.f32 %v268_v49, %v269_v21 }
  0x98   :  { %970 = vmatpush3.bf16.msra.mxu0 %v757_v23  ;;  %v312_v5 = vmax.f32 %v310_v56, %v311_v63  ;;  %v394_v6 = vmax.f32 %v124_v59, %v130_v60  ;;  %v588_v7 = vsel %vm552_vm6, %v491_v50, %v587_v52  ;;  %v187_v11 = vrot.slane %v186_v1, 2 }
  0x99   :  { %v229_v12 = vrot.slane %v228_v3, 2  ;;  %v353_v13 = vrot.slane %v352_v2, 4  ;;  %v621_v17 = vpack.c.bf16 %v588_v7, %v588_v7  ;;  %v271_v18 = vrot.slane %v270_v4, 2 }
  0x9a   :  { %v313_v19 = vrot.slane %v312_v5, 2  ;;  %v395_v20 = vrot.slane %v394_v6, 4  ;;  %v188_v54 = vmax.f32 %v186_v1, %v187_v11  ;;  %v436_v24 = vmax.f32 %v136_v53, %v142_v22  ;;  %v910_v53 = vld [vmem:[%s1277_s2] ss:$0 sm:$0xff] }
  0x9b   :  { %v230_v55 = vmax.f32 %v228_v3, %v229_v12  ;;  %v354_v23 = vmax.f32 %v352_v2, %v353_v13  ;;  %885 = vmatprep.mubr.bf16.mxu0 %v621_v17  ;;  %v272_v25 = vmax.f32 %v270_v4, %v271_v18  ;;  %v478_v14 = vmax.f32 %v148_v8, %v154_v10 }
  0x9c   :  { %v314_v26 = vmax.f32 %v312_v5, %v313_v19  ;;  %v396_v9 = vmax.f32 %v394_v6, %v395_v20  ;;  %v189_v27 = vrot.slane %v188_v54, 1  ;;  %v437_v30 = vrot.slane %v436_v24, 4 }
  0x9d   :  { %v231_v28 = vrot.slane %v230_v55, 1  ;;  %v355_v29 = vrot.slane %v354_v23, 2  ;;  %v273_v31 = vrot.slane %v272_v25, 1  ;;  %v479_v34 = vrot.slane %v478_v14, 4 }
  0x9e   :  { %v315_v32 = vrot.slane %v314_v26, 1  ;;  %v397_v33 = vrot.slane %v396_v9, 2  ;;  %v190_v35 = vmax.f32 %v188_v54, %v189_v27  ;;  %v438_v38 = vmax.f32 %v436_v24, %v437_v30 }
  0x9f   :  { %v232_v36 = vmax.f32 %v230_v55, %v231_v28  ;;  %v356_v37 = vmax.f32 %v354_v23, %v355_v29  ;;  %v274_v39 = vmax.f32 %v272_v25, %v273_v31  ;;  %v480_v15 = vmax.f32 %v478_v14, %v479_v34 }
  0xa0   :  { %v316_v42 = vmax.f32 %v314_v26, %v315_v32  ;;  %v398_v43 = vmax.f32 %v396_v9, %v397_v33  ;;  %v439_v41 = vrot.slane %v438_v38, 2 }
  0xa1   :  { %v357_v40 = vrot.slane %v356_v37, 1  ;;  %v575_v46 = vsel %vm540_vm0, %v232_v36, %v190_v35  ;;  %v481_v44 = vrot.slane %v480_v15, 2 }
  0xa2   :  { %v399_v47 = vrot.slane %v398_v43, 1  ;;  %v576_v45 = vsel %vm542_vm1, %v274_v39, %v575_v46  ;;  %v440_v48 = vmax.f32 %v438_v38, %v439_v41 }
  0xa3   :  { %v358_v16 = vmax.f32 %v356_v37, %v357_v40  ;;  %v577_v49 = vsel %vm544_vm2, %v316_v42, %v576_v45  ;;  %v482_v57 = vmax.f32 %v480_v15, %v481_v44 }
  0xa4   :  { %v400_v56 = vmax.f32 %v398_v43, %v399_v47  ;;  %v441_v58 = vrot.slane %v440_v48, 1 }
  0xa5   :  { %v578_v59 = vsel %vm546_vm3, %v358_v16, %v577_v49  ;;  %v483_v60 = vrot.slane %v482_v57, 1 }
  0xa6   :  { %v579_v61 = vsel %vm548_vm4, %v400_v56, %v578_v59  ;;  %v442_v62 = vmax.f32 %v440_v48, %v441_v58 }
  0xa7   :  { %v484_v50 = vmax.f32 %v482_v57, %v483_v60 }
  0xa8   :  { %v580_v51 = vsel %vm550_vm5, %v442_v62, %v579_v61 }
  0xa9   :  { %v581_v21 = vsel %vm552_vm6, %v484_v50, %v580_v51 }
  0xaa   :  { %v620_v63 = vpack.c.bf16 %v581_v21, %v581_v21 }
  0xac   :  { %886 = vmatmul.mubr.bf16.vlgmr.msra.gmra.mrb[4].mxu0 %v620_v63 }
 0x13a   :  { %v927_v0 = vpop.f32.mrb[0].mxu0 }
 0x13b   :  { %v928_v1 = vpop.f32.mrb[1].mxu0 }
 0x13c   :  { %v929_v3 = vadd.f32 %v928_v1, %v927_v0  ;;  %v930_v2 = vpop.f32.mrb[2].mxu0 }
 0x13d   :  { %v931_v52 = vpop.f32.mrb[3].mxu0 }
 0x13e   :  { %v808_v22 = vadd.f32 %v929_v3, %v910_v53 }
 0x15c   :  { %v949_v4 = vpop.f32.mrb[0].mxu1 }
 0x15d   :  { %v950_v5 = vpop.f32.mrb[1].mxu1 }
 0x15e   :  { %v951_v6 = vadd.f32 %v950_v5, %v949_v4  ;;  %v952_v7 = vpop.f32.mrb[2].mxu1 }
 0x15f   :  { %v953_v8 = vpop.f32.mrb[3].mxu1 }
 0x160   :  { %v848_v10 = vadd.f32 %v951_v6, %v808_v22 }
 0x17f   :  { %v971_v11 = vpop.f32.mrb[4].mxu0 }
 0x180   :  { %v972_v12 = vpop.f32.mrb[5].mxu0 }
 0x181   :  { %v973_v13 = vadd.f32 %v972_v12, %v971_v11  ;;  %v974_v17 = vpop.f32.mrb[6].mxu0 }
 0x182   :  { %v975_v18 = vpop.f32.mrb[7].mxu0 }
 0x183   :  { %v888_v19 = vadd.f32 %v973_v13, %v848_v10 }
 0x185   :  { %893 = vst [vmem:[#allocation8] sm:$0xff] %v888_v19 }
 0x186   :  { %1039 = shalt.err (!%p1036_p6)
}
 0x187   :  { %s1040_s17 = scalar_lea.hbm %s1278_s3, 128 }
 0x188   :  { %p1041_p7 = scmp.ne.s32.totalorder %s1278_s3, %s1040_s17  ;;  %p1044_p8 = scmp.lt.u32.totalorder %s1040_s17, %s1278_s3 }
 0x18a   :  { %p1046_p9 = pnand %p1044_p8, %p1041_p7 }
 0x18c   :  { %1049 = shalt.err (!%p1046_p9)
}
 0x18d   :  { %903 = dma.vmem_to_hbm [thread:$0]  %s901_s14, 128, %s1278_s3, [#allocation5]  }
 0x18e   :  { %1054 = dma.done.wait [#allocation5], 128  }
 0x18f   :  { %1055 = vsyncadd [#allocation5], 4294967168 }
 0x190   :  { %907 = vsyncpa [#allocation4], 1 }
 0x191   :  { %908 = vsyncpa [#allocation7], 1 }
 0x192   :  { %909 = vsyncpa [#allocation5], 1 }

</bundles_post_ra>
